<compile_context>
chip_gen: v5e
topology: v5e:2x2
jax: 0.10.0
libtpu: 0.0.40
codegen_flags: <defaults>
</compile_context>

<pallas_src>
import jax
import jax.numpy as jnp
from jax.experimental import pallas as pl
from jax.experimental.pallas import tpu as pltpu


def _sse_partial_kernel(pred_ref, gt_ref, out_ref):
    # pred_ref / gt_ref: (block_rows, HW) VMEM tile.
    # out_ref: (1, 128) f32 partial-sum block (lane-dense; wrapper reads lane 0).
    diff = pred_ref[...].astype(jnp.float32) - gt_ref[...].astype(jnp.float32)
    sse = jnp.sum(diff * diff)
    out_ref[...] = jnp.full(out_ref.shape, sse, dtype=jnp.float32)


def _pick_block_rows(rows, row_bytes, target_block_bytes=2 * 1024 * 1024):
    """Largest multiple-of-8 divisor of `rows` whose block fits the byte budget.

    Falls back to the full row extent (always legal: block dim == array dim).
    """
    if rows * row_bytes <= target_block_bytes:
        return rows
    best = rows
    for r in range(8, rows, 8):
        if rows % r == 0 and r * row_bytes <= target_block_bytes:
            best = r
    return best if best != rows else rows


def joints_mse_loss(output, target):
    """output, target: (B, J, H, W) arrays (NCHW). Returns scalar float32 loss."""
    B, J, H, W = output.shape
    HW = H * W
    rows, cols = B * J, HW

    # Free reshapes (row-major contiguous) — no transpose, no extra HBM traffic.
    pred = output.reshape(rows, cols)
    gt = target.reshape(rows, cols)

    row_bytes = cols * jnp.dtype(output.dtype).itemsize
    block_rows = _pick_block_rows(rows, row_bytes)
    num_blocks = rows // block_rows

    partial = pl.pallas_call(
        _sse_partial_kernel,
        out_shape=jax.ShapeDtypeStruct((num_blocks, 128), jnp.float32),
        grid_spec=pltpu.PrefetchScalarGridSpec(
            num_scalar_prefetch=0,
            grid=(num_blocks,),
            in_specs=[
                pl.BlockSpec((block_rows, cols), lambda i: (i, 0)),
                pl.BlockSpec((block_rows, cols), lambda i: (i, 0)),
            ],
            out_specs=pl.BlockSpec((1, 128), lambda i: (i, 0)),
        ),
        compiler_params=pltpu.CompilerParams(
            dimension_semantics=("parallel",),
        ),
    )(pred, gt)

    total_elems = jnp.float32(rows * cols)  # B*J*H*W
    return jnp.float32(0.5) * jnp.sum(partial[:, 0]) / total_elems


def joints_mse_loss_ref(output, target):
    """Pure-JAX reference mirroring the PyTorch module exactly."""
    B, J = output.shape[0], output.shape[1]
    pred = output.reshape(B, J, -1).astype(jnp.float32)
    gt = target.reshape(B, J, -1).astype(jnp.float32)
    loss = 0.0
    for idx in range(J):
        loss = loss + 0.5 * jnp.mean((pred[:, idx, :] - gt[:, idx, :]) ** 2)
    return loss / J


if __name__ == "__main__":
    # Small shapes consistent with the module: batch=2, joints=4, heatmap 16x16.
    key = jax.random.PRNGKey(0)
    k1, k2 = jax.random.split(key)
    B, J, H, W = 2, 4, 16, 16
    output = jax.random.normal(k1, (B, J, H, W), dtype=jnp.float32)
    target = jax.random.normal(k2, (B, J, H, W), dtype=jnp.float32)

    loss = jax.block_until_ready(joints_mse_loss(output, target))
    ref = jax.block_until_ready(joints_mse_loss_ref(output, target))

    assert jnp.allclose(loss, ref, rtol=1e-5, atol=1e-6), (loss, ref)
    print("KERNEL_OK")
</pallas_src>

<mosaic_0001>
module attributes {stable_mosaic.version = 11 : i64} {
  func.func @_sse_partial_kernel(%arg0: i32, %arg1: memref<8x256xf32, #tpu.memory_space<vmem>>, %arg2: memref<8x256xf32, #tpu.memory_space<vmem>>, %arg3: memref<1x128xf32, #tpu.memory_space<vmem>>) attributes {dimension_semantics = [#tpu.dimension_semantics<parallel>], iteration_bounds = array<i64: 1>, scalar_prefetch = 0 : i64, scratch_operands = 0 : i64, tpu.core_type = #tpu.core_type<tc>, window_params = [{transform_indices = @transform_0, window_bounds = array<i64: 8, 256>}, {transform_indices = @transform_1, window_bounds = array<i64: 8, 256>}, {transform_indices = @transform_2, window_bounds = array<i64: 1, 128>}]} {
    %c0 = arith.constant 0 : index
    %c0_0 = arith.constant 0 : index
    %0 = vector.load %arg1[%c0, %c0_0] : memref<8x256xf32, #tpu.memory_space<vmem>>, vector<8x256xf32>
    %c0_1 = arith.constant 0 : index
    %c0_2 = arith.constant 0 : index
    %1 = vector.load %arg2[%c0_1, %c0_2] : memref<8x256xf32, #tpu.memory_space<vmem>>, vector<8x256xf32>
    %2 = arith.subf %0, %1 : vector<8x256xf32>
    %3 = arith.mulf %2, %2 : vector<8x256xf32>
    %4 = vector.shape_cast %3 : vector<8x256xf32> to vector<1x8x256xf32>
    %cst = arith.constant dense<0.000000e+00> : vector<1xf32>
    %5 = vector.multi_reduction <add>, %4, %cst [1, 2] : vector<1x8x256xf32> to vector<1xf32>
    %6 = vector.shape_cast %5 : vector<1xf32> to vector<1x1x1xf32>
    %7 = vector.extract %6[0, 0, 0] : f32 from vector<1x1x1xf32>
    %8 = vector.broadcast %7 : f32 to vector<1x128xf32>
    %c0_3 = arith.constant 0 : index
    %c0_4 = arith.constant 0 : index
    %9 = vector.load %arg3[%c0_3, %c0_4] : memref<1x128xf32, #tpu.memory_space<vmem>>, vector<1x128xf32>
    tpu.vector_store %arg3[%c0_3, %c0_4], %8 {strides = array<i32>} : memref<1x128xf32, #tpu.memory_space<vmem>>, vector<1x128xf32>,
    return
  }
  func.func @transform_0(%arg0: i32) -> (i32, i32) {
    %c0_i32 = arith.constant 0 : i32
    %c0_i32_0 = arith.constant 0 : i32
    return %arg0, %c0_i32 : i32, i32
  }
  func.func @transform_1(%arg0: i32) -> (i32, i32) {
    %c0_i32 = arith.constant 0 : i32
    %c0_i32_0 = arith.constant 0 : i32
    return %arg0, %c0_i32 : i32, i32
  }
  func.func @transform_2(%arg0: i32) -> (i32, i32) {
    %c0_i32 = arith.constant 0 : i32
    %c0_i32_0 = arith.constant 0 : i32
    return %arg0, %c0_i32 : i32, i32
  }
}

</mosaic_0001>

<bundles_post_ra>
// kernel: tpu_custom_call.1
= control target key start
LH: loop header
LB: loop body
LE: loop exit
PB: predicated region body
PF: predicated region fallthrough
CT: control target
= control target key end

     0   :  { %7 = vsyncpa [#allocation3], 0  ;;  %s188_s0 = inlined_call_operand.hbm [shape: f32[8,256], index: 0, kind: input, shape index: {}]   ;;  %s189_s1 = inlined_call_operand.hbm [shape: f32[8,256], index: 1, kind: input, shape index: {}]   ;;  %s190_s2 = inlined_call_operand.hbm [shape: f32[1,128], index: 2, kind: output, shape index: {}]  }
   0x1   :  { %8 = vsyncpa [#allocation6], 0 }
   0x2   :  { %9 = vsyncpa [#allocation4], 0  ;;  %s15_s11 = sshll.u32 %s188_s0, 4  ;;  %s161_s12 = smov [#allocation2]   ;;  %s16_s11 = int_to_ptr.hbm [resolvable:$true] %s15_s11 }
   0x3   :  { %s17_s13 = sshll.u32 %s161_s12, 4  ;;  %s26_s16 = sshll.u32 %s189_s1, 4  ;;  %s18_s13 = int_to_ptr.vmem [resolvable:$true] %s17_s13  ;;  %s27_s16 = int_to_ptr.hbm [resolvable:$true] %s26_s16 }
   0x4   :  { %20 = dma.hbm_to_vmem [thread:$0]  %s16_s11, 256, %s18_s13, [#allocation3]  }
   0x5   :  { %s162_s17 = smov [#allocation5]  }
   0x6   :  { %s28_s18 = sshll.u32 %s162_s17, 4  ;;  %s29_s18 = int_to_ptr.vmem [resolvable:$true] %s28_s18 }
   0x7   :  { %31 = dma.hbm_to_vmem [thread:$0]  %s27_s16, 256, %s29_s18, [#allocation6]  }
   0x8   :  { %155 = dma.done.wait [#allocation3], 256  }
   0x9   :  { %156 = vsyncadd [#allocation3], 4294967040 }
   0xa   :  { %157 = dma.done.wait [#allocation6], 256  }
   0xb   :  { %158 = vsyncadd [#allocation6], 4294967040  ;;  %v40_v0 = vld [vmem:[#allocation2] sm:$0xff]  ;;  %v41_v1 = vld [vmem:[#allocation2 + $0x8] sm:$0xff]  ;;  %s163_s0 = smov [#allocation7]   ;;  %s67_s21 = sshll.u32 %s190_s2, 4  ;;  %s68_s21 = int_to_ptr.hbm [resolvable:$true] %s67_s21 }
   0xc   :  { %v42_v2 = vld [vmem:[#allocation5] sm:$0xff]  ;;  %v43_v3 = vld [vmem:[#allocation5 + $0x8] sm:$0xff]  ;;  %s65_s1 = sshll.u32 %s163_s0, 4  ;;  %s66_s1 = int_to_ptr.vmem [resolvable:$true] %s65_s1 }
   0xd   :  { %v44_v4 = vsub.f32 %v40_v0, %v42_v2  ;;  %v45_v5 = vsub.f32 %v41_v1, %v43_v3 }
   0xf   :  { %v46_v6 = vmul.f32 %v44_v4, %v44_v4  ;;  %v47_v7 = vmul.f32 %v45_v5, %v45_v5 }
  0x11   :  { %v48_v8 = vadd.f32 %v47_v7, %v46_v6 }
  0x13   :  { %49 = vadd.xlane.f32.xlu0 %v48_v8 }
  0x86   :  { %v50_v9 = vpop.xlane.xlu0 %49 }
  0x87   :  { %v51_v10 = vrot.slane %v50_v9, 4 }
  0x89   :  { %v52_v11 = vadd.f32 %v51_v10, %v50_v9 }
  0x8b   :  { %v53_v12 = vrot.slane %v52_v11, 2 }
  0x8d   :  { %v54_v13 = vadd.f32 %v53_v12, %v52_v11 }
  0x8f   :  { %v55_v14 = vrot.slane %v54_v13, 1 }
  0x91   :  { %v56_v15 = vadd.f32 %v55_v14, %v54_v13 }
  0x93   :  { %78 = vpush %v56_v15 }
  0xc4   :  { %s79_s22 = spop %78 }
  0xc5   :  { %v58_v16 = vstv %s79_s22 }
  0xc6   :  { %59 = vst [vmem:[#allocation7] sm:$0x1] %v58_v16 }
  0xc7   :  { %70 = dma.vmem_to_hbm [thread:$0]  %s66_s1, 16, %s68_s21, [#allocation4]  }
  0xc8   :  { %159 = dma.done.wait [#allocation4], 16  }
  0xc9   :  { %160 = vsyncadd [#allocation4], 4294967280 }
  0xca   :  { %75 = vsyncpa [#allocation3], 1 }
  0xcb   :  { %76 = vsyncpa [#allocation6], 1 }
  0xcc   :  { %77 = vsyncpa [#allocation4], 1 }

</bundles_post_ra>
